<compile_context>
chip_gen: v7x
topology: tpu7x:2x2x1
jax: 0.10.0
libtpu: 0.0.40
codegen_flags: <defaults>
</compile_context>

<pallas_src>
import functools

import jax
import jax.numpy as jnp
from jax.experimental import pallas as pl
from jax.experimental.pallas import tpu as pltpu


def _round_up(x: int, m: int) -> int:
    return ((x + m - 1) // m) * m


def _chip_flags():
    """(is_v7x, prefers_bf16) from the local device kind."""
    kind = ""
    try:
        kind = jax.devices()[0].device_kind.lower()
    except Exception:
        pass
    is_v7 = ("v7" in kind) or ("7x" in kind)
    prefers_bf16 = is_v7 or ("v6" in kind)
    return is_v7, prefers_bf16


def _vmem_budget_bytes(is_v7: bool):
    """(block-sizing budget, vmem_limit_bytes) with headroom for internal scratch."""
    try:
        cap = int(pltpu.get_tpu_info().vmem_capacity_bytes)
    except Exception:
        cap = (64 if is_v7 else 128) * 1024 * 1024
    limit = min(cap // 2, 64 * 1024 * 1024)        # ~32 MiB on v7x, ~64 MiB on v5e/v6e
    budget = (limit * 4) // 5                       # leave ~20% for Mosaic scratch
    return budget, limit


def _supports_pipeline_mode() -> bool:
    try:
        pl.BlockSpec((8, 128), lambda i: (i, 0), pipeline_mode=pl.Buffered(1))
        return True
    except Exception:
        return False


_HAS_PIPELINE_MODE = _supports_pipeline_mode()


def _resident_spec(block_shape):
    """BlockSpec for an operand that is constant across the grid (single-buffered)."""
    if _HAS_PIPELINE_MODE:
        return pl.BlockSpec(block_shape, lambda i: (0, 0), pipeline_mode=pl.Buffered(1))
    return pl.BlockSpec(block_shape, lambda i: (0, 0))


def _mlp_kernel(x_ref, w1_ref, b1_ref, w2_ref, b2_ref, w3_ref, b3_ref, o_ref):
    cd = w1_ref.dtype            # MXU compute dtype (bf16 on v6e/v7x, f32 on v5e)
    ep = b1_ref.dtype            # epilogue dtype (bf16 on v6e/v7x, f32 on v5e)
    x = x_ref[...].astype(cd)    # no-op when x already in compute dtype

    # Layer 1: MXU matmul with f32 accumulation, bias+ReLU epilogue on the VPU.
    h = jnp.dot(x, w1_ref[...], preferred_element_type=jnp.float32)
    h = jnp.maximum(h.astype(ep) + b1_ref[...], 0.0).astype(cd)
    # Layer 2: Linear(hidden -> hidden) + ReLU.
    h = jnp.dot(h, w2_ref[...], preferred_element_type=jnp.float32)
    h = jnp.maximum(h.astype(ep) + b2_ref[...], 0.0).astype(cd)
    # Layer 3: Linear(hidden -> dim), no activation.
    y = jnp.dot(h, w3_ref[...], preferred_element_type=jnp.float32)
    o_ref[...] = (y.astype(ep) + b3_ref[...]).astype(o_ref.dtype)


def prepare_mlp_params(w1, b1, w2, b2, w3, b3, *, compute_dtype=None):
    """Pad / cast parameters ONCE (hoisted out of the per-call path).

    Only the hidden axis is zero-padded to a multiple of 128 lanes so the
    intermediate activations and weight tiles are lane-dense; the feature dim
    `dim` stays unpadded (legal: block last-dim == full array dim), avoiding
    inflated x/out HBM traffic for small dims.
    """
    is_v7, prefers_bf16 = _chip_flags()
    if compute_dtype is None:
        compute_dtype = jnp.bfloat16 if prefers_bf16 else jnp.float32
    compute_dtype = jnp.dtype(compute_dtype)
    # bf16 epilogue only where the VPU supports it (v6e / v7x); f32 elsewhere.
    ep_dtype = compute_dtype if (prefers_bf16 and compute_dtype == jnp.bfloat16) else jnp.float32

    dim, hidden = w1.shape
    hidden_p = _round_up(hidden, 128)

    w1_p = jnp.zeros((dim, hidden_p), compute_dtype).at[:, :hidden].set(w1.astype(compute_dtype))
    w2_p = jnp.zeros((hidden_p, hidden_p), compute_dtype).at[:hidden, :hidden].set(w2.astype(compute_dtype))
    w3_p = jnp.zeros((hidden_p, dim), compute_dtype).at[:hidden, :].set(w3.astype(compute_dtype))
    b1_p = jnp.zeros((1, hidden_p), ep_dtype).at[:, :hidden].set(b1.astype(ep_dtype))
    b2_p = jnp.zeros((1, hidden_p), ep_dtype).at[:, :hidden].set(b2.astype(ep_dtype))
    b3_p = b3.astype(ep_dtype).reshape(1, dim)
    return w1_p, b1_p, w2_p, b2_p, w3_p, b3_p


@functools.partial(jax.jit, static_argnames=("block_b",))
def mlp_forward(x, w1_p, b1_p, w2_p, b2_p, w3_p, b3_p, *, block_b=None):
    """Fused 3-layer MLP on prepared (padded, cast) params.

    x: (B, dim); returns (B, dim) in x.dtype.
    """
    B, dim = x.shape
    hidden_p = w1_p.shape[1]
    out_dtype = x.dtype

    is_v7, _ = _chip_flags()
    budget, vmem_limit = _vmem_budget_bytes(is_v7)

    f32 = 4
    x_isz = jnp.dtype(x.dtype).itemsize
    out_isz = x_isz
    cd_isz = jnp.dtype(w1_p.dtype).itemsize
    ep_isz = jnp.dtype(b1_p.dtype).itemsize

    # Resident weights/biases are single-buffered (no 2x factor).
    weight_bytes = cd_isz * (dim * hidden_p + hidden_p * hidden_p + hidden_p * dim)
    bias_bytes = ep_isz * (2 * hidden_p + dim)
    # Per-batch-row live bytes: double-buffered x/out tiles, f32 accumulators,
    # epilogue + compute-dtype copies of h, and the final f32 y tile.
    per_row = (2 * x_isz * dim + 2 * out_isz * dim
               + 2 * f32 * hidden_p + (ep_isz + cd_isz) * hidden_p
               + f32 * dim)
    cap = max(8, (budget - weight_bytes - bias_bytes) // per_row)

    B8 = _round_up(B, 8)
    if block_b is None:
        block_b = 512
    block_b = int(min(block_b, cap, B8))
    if block_b >= B8:
        block_b = B8
    elif block_b >= 128:
        block_b = (block_b // 128) * 128          # MXU/sublane aligned (v5e-friendly)
    else:
        block_b = min(B8, max(16, (block_b // 16) * 16))

    # v7x megacore: prefer an even number of grid steps across the 2 TCs.
    steps = -(-B8 // block_b)
    if is_v7 and block_b > 128 and steps % 2 == 1:
        cand = max(128, ((block_b // 2) // 128) * 128)
        if -(-B8 // cand) % 2 == 0:
            block_b = cand

    grid = (pl.cdiv(B8, block_b),)
    x_in = x if B8 == B else jnp.pad(x, ((0, B8 - B), (0, 0)))

    out_p = pl.pallas_call(
        _mlp_kernel,
        out_shape=jax.ShapeDtypeStruct((B8, dim), out_dtype),
        grid_spec=pltpu.PrefetchScalarGridSpec(
            num_scalar_prefetch=0,
            grid=grid,
            in_specs=[
                pl.BlockSpec((block_b, dim), lambda i: (i, 0)),   # x tile (streams)
                _resident_spec((dim, hidden_p)),                  # w1
                _resident_spec((1, hidden_p)),                    # b1
                _resident_spec((hidden_p, hidden_p)),             # w2
                _resident_spec((1, hidden_p)),                    # b2
                _resident_spec((hidden_p, dim)),                  # w3
                _resident_spec((1, dim)),                         # b3
            ],
            out_specs=pl.BlockSpec((block_b, dim), lambda i: (i, 0)),
        ),
        compiler_params=pltpu.CompilerParams(
            dimension_semantics=("parallel",),
            vmem_limit_bytes=int(vmem_limit),
        ),
    )(x_in, w1_p, b1_p, w2_p, b2_p, w3_p, b3_p)

    # TODO(synk): for hidden large enough that resident weights exceed the VMEM
    # budget (esp. v7x 64 MiB), add an "arbitrary" grid axis tiling the hidden/N
    # dimension of w1/w2/w3 instead of keeping all weights resident.
    return out_p if B8 == B else out_p[:B]


def init_mlp_params(key, dim, hidden_dim, dtype=jnp.float32):
    """Deterministic parameter init (uniform, PyTorch-Linear-like fan_in bound)."""
    k = jax.random.split(key, 6)

    def lin(kw, kb, fan_in, fan_out):
        bound = 1.0 / (fan_in ** 0.5)
        # Stored as (in, out) == transposed PyTorch weight, so kernel does x @ W.
        w = jax.random.uniform(kw, (fan_in, fan_out), dtype, -bound, bound)
        b = jax.random.uniform(kb, (fan_out,), dtype, -bound, bound)
        return w, b

    w1, b1 = lin(k[0], k[1], dim, hidden_dim)
    w2, b2 = lin(k[2], k[3], hidden_dim, hidden_dim)
    w3, b3 = lin(k[4], k[5], hidden_dim, dim)
    return w1, b1, w2, b2, w3, b3


def mlp_reference(x, w1, b1, w2, b2, w3, b3, *, compute_dtype=jnp.float32):
    cd = jnp.dtype(compute_dtype)
    f32 = jnp.float32
    h = jnp.dot(x.astype(cd), w1.astype(cd), preferred_element_type=f32)
    h = jnp.maximum(h + b1.astype(f32), 0.0)
    h = jnp.dot(h.astype(cd), w2.astype(cd), preferred_element_type=f32)
    h = jnp.maximum(h + b2.astype(f32), 0.0)
    y = jnp.dot(h.astype(cd), w3.astype(cd), preferred_element_type=f32)
    return (y + b3.astype(f32)).astype(x.dtype)


if __name__ == "__main__":
    key = jax.random.PRNGKey(0)
    kx, kp, kx2 = jax.random.split(key, 3)

    # Small shape consistent with the module.
    batch, dim, hidden_dim = 8, 16, 32
    x = jax.random.normal(kx, (batch, dim), jnp.float32)
    raw = init_mlp_params(kp, dim, hidden_dim)

    # 1) Explicit f32 compute path: exact vs reference.
    p_f32 = prepare_mlp_params(*raw, compute_dtype=jnp.float32)
    out = jax.block_until_ready(mlp_forward(x, *p_f32))
    ref = mlp_reference(x, *raw)
    assert out.shape == (batch, dim)
    assert jnp.allclose(out, ref, atol=1e-4, rtol=1e-4), "mismatch vs JAX reference (f32)"

    # 2) Generation-default compute path (bf16 on v6e/v7x, f32 otherwise).
    p_def = prepare_mlp_params(*raw)
    cd_def = p_def[0].dtype
    out_d = jax.block_until_ready(mlp_forward(x, *p_def))
    ref_d = mlp_reference(x, *raw, compute_dtype=cd_def)
    tol = 1e-4 if cd_def == jnp.float32 else 3e-2
    assert jnp.allclose(out_d, ref_d, atol=tol, rtol=tol), "mismatch vs JAX reference (default dtype)"

    # 3) Larger, non-aligned batch: multiple grid steps + partial edge block.
    big_batch = 1030
    x_big = jax.random.normal(kx2, (big_batch, dim), jnp.float32)
    out_big = jax.block_until_ready(mlp_forward(x_big, *p_f32))
    ref_big = mlp_reference(x_big, *raw)
    assert out_big.shape == (big_batch, dim)
    assert jnp.allclose(out_big, ref_big, atol=1e-4, rtol=1e-4), "mismatch vs JAX reference (tiled)"

    print("KERNEL_OK")
</pallas_src>

<mosaic_0001>
module attributes {stable_mosaic.version = 11 : i64} {
  func.func @_mlp_kernel(%arg0: i32, %arg1: memref<8x16xf32, #tpu.memory_space<vmem>>, %arg2: memref<16x128xf32, #tpu.memory_space<vmem>>, %arg3: memref<1x128xf32, #tpu.memory_space<vmem>>, %arg4: memref<128x128xf32, #tpu.memory_space<vmem>>, %arg5: memref<1x128xf32, #tpu.memory_space<vmem>>, %arg6: memref<128x16xf32, #tpu.memory_space<vmem>>, %arg7: memref<1x16xf32, #tpu.memory_space<vmem>>, %arg8: memref<8x16xf32, #tpu.memory_space<vmem>>) attributes {dimension_semantics = [#tpu.dimension_semantics<parallel>], iteration_bounds = array<i64: 1>, scalar_prefetch = 0 : i64, scratch_operands = 0 : i64, tpu.core_type = #tpu.core_type<tc>, window_params = [{transform_indices = @transform_0, window_bounds = array<i64: 8, 16>}, {pipeline_mode = #tpu.pipeline_mode<synchronous>, transform_indices = @transform_1, window_bounds = array<i64: 16, 128>}, {pipeline_mode = #tpu.pipeline_mode<synchronous>, transform_indices = @transform_2, window_bounds = array<i64: 1, 128>}, {pipeline_mode = #tpu.pipeline_mode<synchronous>, transform_indices = @transform_3, window_bounds = array<i64: 128, 128>}, {pipeline_mode = #tpu.pipeline_mode<synchronous>, transform_indices = @transform_4, window_bounds = array<i64: 1, 128>}, {pipeline_mode = #tpu.pipeline_mode<synchronous>, transform_indices = @transform_5, window_bounds = array<i64: 128, 16>}, {pipeline_mode = #tpu.pipeline_mode<synchronous>, transform_indices = @transform_6, window_bounds = array<i64: 1, 16>}, {transform_indices = @transform_7, window_bounds = array<i64: 8, 16>}]} {
    %c0 = arith.constant 0 : index
    %c0_0 = arith.constant 0 : index
    %0 = vector.load %arg1[%c0, %c0_0] : memref<8x16xf32, #tpu.memory_space<vmem>>, vector<8x16xf32>
    %c0_1 = arith.constant 0 : index
    %c0_2 = arith.constant 0 : index
    %1 = vector.load %arg2[%c0_1, %c0_2] : memref<16x128xf32, #tpu.memory_space<vmem>>, vector<16x128xf32>
    %cst = arith.constant dense<0.000000e+00> : vector<8x128xf32>
    %2 = tpu.matmul %0, %1, %cst {dimension_numbers = #tpu.dot_dimension_numbers<[1], [0], [0], [1], [0, 0, 1, 1], [], []>} : vector<8x16xf32>, vector<16x128xf32>, vector<8x128xf32> -> vector<8x128xf32>
    %c0_3 = arith.constant 0 : index
    %c0_4 = arith.constant 0 : index
    %3 = vector.load %arg3[%c0_3, %c0_4] : memref<1x128xf32, #tpu.memory_space<vmem>>, vector<1x128xf32>
    %4 = vector.broadcast %3 : vector<1x128xf32> to vector<8x128xf32>
    %5 = arith.addf %2, %4 : vector<8x128xf32>
    %cst_5 = arith.constant 0.000000e+00 : f32
    %6 = vector.broadcast %cst_5 : f32 to vector<8x128xf32>
    %7 = arith.maximumf %5, %6 : vector<8x128xf32>
    %c0_6 = arith.constant 0 : index
    %c0_7 = arith.constant 0 : index
    %8 = vector.load %arg4[%c0_6, %c0_7] : memref<128x128xf32, #tpu.memory_space<vmem>>, vector<128x128xf32>
    %cst_8 = arith.constant dense<0.000000e+00> : vector<8x128xf32>
    %9 = tpu.matmul %7, %8, %cst_8 {dimension_numbers = #tpu.dot_dimension_numbers<[1], [0], [0], [1], [0, 0, 1, 1], [], []>} : vector<8x128xf32>, vector<128x128xf32>, vector<8x128xf32> -> vector<8x128xf32>
    %c0_9 = arith.constant 0 : index
    %c0_10 = arith.constant 0 : index
    %10 = vector.load %arg5[%c0_9, %c0_10] : memref<1x128xf32, #tpu.memory_space<vmem>>, vector<1x128xf32>
    %11 = vector.broadcast %10 : vector<1x128xf32> to vector<8x128xf32>
    %12 = arith.addf %9, %11 : vector<8x128xf32>
    %cst_11 = arith.constant 0.000000e+00 : f32
    %13 = vector.broadcast %cst_11 : f32 to vector<8x128xf32>
    %14 = arith.maximumf %12, %13 : vector<8x128xf32>
    %c0_12 = arith.constant 0 : index
    %c0_13 = arith.constant 0 : index
    %15 = vector.load %arg6[%c0_12, %c0_13] : memref<128x16xf32, #tpu.memory_space<vmem>>, vector<128x16xf32>
    %cst_14 = arith.constant dense<0.000000e+00> : vector<8x16xf32>
    %16 = tpu.matmul %14, %15, %cst_14 {dimension_numbers = #tpu.dot_dimension_numbers<[1], [0], [0], [1], [0, 0, 1, 1], [], []>} : vector<8x128xf32>, vector<128x16xf32>, vector<8x16xf32> -> vector<8x16xf32>
    %c0_15 = arith.constant 0 : index
    %c0_16 = arith.constant 0 : index
    %17 = vector.load %arg7[%c0_15, %c0_16] : memref<1x16xf32, #tpu.memory_space<vmem>>, vector<1x16xf32>
    %18 = vector.broadcast %17 : vector<1x16xf32> to vector<8x16xf32>
    %19 = arith.addf %16, %18 : vector<8x16xf32>
    %c0_17 = arith.constant 0 : index
    %c0_18 = arith.constant 0 : index
    %20 = vector.load %arg8[%c0_17, %c0_18] : memref<8x16xf32, #tpu.memory_space<vmem>>, vector<8x16xf32>
    tpu.vector_store %arg8[%c0_17, %c0_18], %19 {strides = array<i32>} : memref<8x16xf32, #tpu.memory_space<vmem>>, vector<8x16xf32>,
    return
  }
  func.func @transform_0(%arg0: i32) -> (i32, i32) {
    %c0_i32 = arith.constant 0 : i32
    %c0_i32_0 = arith.constant 0 : i32
    return %arg0, %c0_i32 : i32, i32
  }
  func.func @transform_1(%arg0: i32) -> (i32, i32) {
    %c0_i32 = arith.constant 0 : i32
    %c0_i32_0 = arith.constant 0 : i32
    %c0_i32_1 = arith.constant 0 : i32
    return %c0_i32, %c0_i32_0 : i32, i32
  }
  func.func @transform_2(%arg0: i32) -> (i32, i32) {
    %c0_i32 = arith.constant 0 : i32
    %c0_i32_0 = arith.constant 0 : i32
    %c0_i32_1 = arith.constant 0 : i32
    return %c0_i32, %c0_i32_0 : i32, i32
  }
  func.func @transform_3(%arg0: i32) -> (i32, i32) {
    %c0_i32 = arith.constant 0 : i32
    %c0_i32_0 = arith.constant 0 : i32
    %c0_i32_1 = arith.constant 0 : i32
    return %c0_i32, %c0_i32_0 : i32, i32
  }
  func.func @transform_4(%arg0: i32) -> (i32, i32) {
    %c0_i32 = arith.constant 0 : i32
    %c0_i32_0 = arith.constant 0 : i32
    %c0_i32_1 = arith.constant 0 : i32
    return %c0_i32, %c0_i32_0 : i32, i32
  }
  func.func @transform_5(%arg0: i32) -> (i32, i32) {
    %c0_i32 = arith.constant 0 : i32
    %c0_i32_0 = arith.constant 0 : i32
    %c0_i32_1 = arith.constant 0 : i32
    return %c0_i32, %c0_i32_0 : i32, i32
  }
  func.func @transform_6(%arg0: i32) -> (i32, i32) {
    %c0_i32 = arith.constant 0 : i32
    %c0_i32_0 = arith.constant 0 : i32
    %c0_i32_1 = arith.constant 0 : i32
    return %c0_i32, %c0_i32_0 : i32, i32
  }
  func.func @transform_7(%arg0: i32) -> (i32, i32) {
    %c0_i32 = arith.constant 0 : i32
    %c0_i32_0 = arith.constant 0 : i32
    return %arg0, %c0_i32 : i32, i32
  }
}

</mosaic_0001>

<bundles_post_ra>
// kernel: mlp_forward.1
= control target key start
LH: loop header
LB: loop body
LE: loop exit
PB: predicated region body
PF: predicated region fallthrough
CT: control target
= control target key end

     0   :  { %12 = vsyncpa [#allocation3], 0  ;;  %s953_s0 = inlined_call_operand.hbm [shape: f32[8,16], index: 0, kind: input, shape index: {}]   ;;  %s954_s1 = inlined_call_operand.hbm [shape: f32[16,128], index: 1, kind: input, shape index: {}]   ;;  %s955_s2 = inlined_call_operand.hbm [shape: f32[1,128], index: 2, kind: input, shape index: {}]   ;;  %s956_s3 = inlined_call_operand.hbm [shape: f32[128,128], index: 3, kind: input, shape index: {}]   ;;  %s957_s4 = inlined_call_operand.hbm [shape: f32[1,128], index: 4, kind: input, shape index: {}]   ;;  %s958_s5 = inlined_call_operand.hbm [shape: f32[128,16], index: 5, kind: input, shape index: {}]   ;;  %s959_s6 = inlined_call_operand.hbm [shape: f32[1,16], index: 6, kind: input, shape index: {}]   ;;  %s960_s7 = inlined_call_operand.hbm [shape: f32[8,16], index: 7, kind: output, shape index: {}]  }
   0x1   :  { %13 = vsyncpa [#allocation6], 0 }
   0x2   :  { %14 = vsyncpa [#allocation9], 0 }
   0x3   :  { %15 = vsyncpa [#allocation12], 0 }
   0x4   :  { %16 = vsyncpa [#allocation4], 0  ;;  %s773_s24 = smov [#allocation5]   ;;  %s587_s28 = scalar_lea.hbm %s954_s1, 256 }
   0x5   :  { %s32_s25 = sshll.u32 %s773_s24, 4  ;;  %p588_p0 = scmp.ne.s32.totalorder %s954_s1, %s587_s28  ;;  %s33_s25 = int_to_ptr.vmem [resolvable:$true] %s32_s25 }
   0x6   :  { %p591_p1 = scmp.lt.u32.totalorder %s587_s28, %s954_s1 }
   0x8   :  { %p593_p2 = pnand %p591_p1, %p588_p0 }
   0xa   :  { %596 = shalt.err (!%p593_p2)
}
   0xb   :  { %s597_s10 = scalar_lea.vmem %s33_s25, 256  ;;  %p602_p4 = scmp.lt.s32.totalorder %s33_s25, %s33_s25 }
   0xc   :  { %p598_p3 = scmp.ne.s32.totalorder %s33_s25, %s597_s10  ;;  %p603_p5 = scmp.lt.s32.totalorder %s597_s10, %s597_s10 }
   0xe   :  { %p604_p6 = por %p603_p5, %p602_p4 }
  0x10   :  { %p605_p7 = pnand %p604_p6, %p598_p3 }
  0x12   :  { %608 = shalt.err (!%p605_p7)
}
  0x13   :  { %s774_s11 = smov 128   ;;  %s775_s12 = smov 8  }
  0x14   :  { %38 = dma.hbm_to_vmem [thread:$0]  %s954_s1, 256, %s33_s25, [#allocation6], %s774_s11, %s774_s11, %s775_s12  }
  0x15   :  { %s776_s15 = smov [#allocation8]   ;;  %s777_s17 = smov [#allocation11]  }
  0x16   :  { %s54_s16 = sshll.u32 %s776_s15, 4  ;;  %s76_s18 = sshll.u32 %s777_s17, 4  ;;  %s55_s16 = int_to_ptr.vmem [resolvable:$true] %s54_s16  ;;  %s77_s18 = int_to_ptr.vmem [resolvable:$true] %s76_s18 }
  0x17   :  { %s609_s21 = scalar_lea.hbm %s956_s3, 2048 }
  0x18   :  { %p610_p8 = scmp.ne.s32.totalorder %s956_s3, %s609_s21  ;;  %p613_p9 = scmp.lt.u32.totalorder %s609_s21, %s956_s3 }
  0x1a   :  { %p615_p10 = pnand %p613_p9, %p610_p8 }
  0x1c   :  { %618 = shalt.err (!%p615_p10)
}
  0x1d   :  { %s619_s1 = scalar_lea.vmem %s55_s16, 2048  ;;  %p624_p12 = scmp.lt.s32.totalorder %s55_s16, %s55_s16 }
  0x1e   :  { %p620_p11 = scmp.ne.s32.totalorder %s55_s16, %s619_s1  ;;  %p625_p13 = scmp.lt.s32.totalorder %s619_s1, %s619_s1 }
  0x20   :  { %p626_p0 = por %p625_p13, %p624_p12 }
  0x22   :  { %p627_p1 = pnand %p626_p0, %p620_p11 }
  0x24   :  { %630 = shalt.err (!%p627_p1)
}
  0x25   :  { %60 = dma.hbm_to_vmem [thread:$0]  %s956_s3, 2048, %s55_s16, [#allocation9], %s774_s11, %s774_s11, %s775_s12  }
  0x26   :  { %s631_s30 = scalar_lea.hbm %s958_s5, 2048 }
  0x27   :  { %p632_p2 = scmp.ne.s32.totalorder %s958_s5, %s631_s30  ;;  %p635_p3 = scmp.lt.u32.totalorder %s631_s30, %s958_s5 }
  0x29   :  { %p637_p4 = pnand %p635_p3, %p632_p2 }
  0x2b   :  { %640 = shalt.err (!%p637_p4)
}
  0x2c   :  { %s641_s14 = scalar_lea.vmem %s77_s18, 2048  ;;  %p646_p6 = scmp.lt.s32.totalorder %s77_s18, %s77_s18 }
  0x2d   :  { %p642_p5 = scmp.ne.s32.totalorder %s77_s18, %s641_s14  ;;  %p647_p7 = scmp.lt.s32.totalorder %s641_s14, %s641_s14 }
  0x2f   :  { %p648_p8 = por %p647_p7, %p646_p6 }
  0x31   :  { %p649_p9 = pnand %p648_p8, %p642_p5 }
  0x33   :  { %652 = shalt.err (!%p649_p9)
}
  0x34   :  { %82 = dma.hbm_to_vmem [thread:$0]  %s958_s5, 2048, %s77_s18, [#allocation12], %s774_s11, %s774_s11, %s775_s12  }
  0x35   :  { %s778_s16 = smov [#allocation2]   ;;  %s779_s19 = smov [#allocation7]  }
  0x36   :  { %s23_s17 = sshll.u32 %s778_s16, 4  ;;  %s45_s20 = sshll.u32 %s779_s19, 4  ;;  %s24_s17 = int_to_ptr.vmem [resolvable:$true] %s23_s17  ;;  %s46_s20 = int_to_ptr.vmem [resolvable:$true] %s45_s20 }
  0x37   :  { %s653_s23 = scalar_lea.hbm %s953_s0, 128 }
  0x38   :  { %p654_p10 = scmp.ne.s32.totalorder %s953_s0, %s653_s23  ;;  %p657_p11 = scmp.lt.u32.totalorder %s653_s23, %s953_s0 }
  0x3a   :  { %p659_p12 = pnand %p657_p11, %p654_p10 }
  0x3c   :  { %662 = shalt.err (!%p659_p12)
}
  0x3d   :  { %s663_s5 = scalar_lea.vmem %s24_s17, 128  ;;  %p668_p0 = scmp.lt.s32.totalorder %s24_s17, %s24_s17 }
  0x3e   :  { %p664_p13 = scmp.ne.s32.totalorder %s24_s17, %s663_s5  ;;  %p669_p1 = scmp.lt.s32.totalorder %s663_s5, %s663_s5 }
  0x40   :  { %p670_p2 = por %p669_p1, %p668_p0 }
  0x42   :  { %p671_p3 = pnand %p670_p2, %p664_p13 }
  0x44   :  { %674 = shalt.err (!%p671_p3)
}
  0x45   :  { %26 = dma.hbm_to_vmem [thread:$0]  %s953_s0, 128, %s24_s17, [#allocation3]  }
  0x46   :  { %s675_s28 = scalar_lea.hbm %s955_s2, 16 }
  0x47   :  { %p676_p4 = scmp.ne.s32.totalorder %s955_s2, %s675_s28  ;;  %p679_p5 = scmp.lt.u32.totalorder %s675_s28, %s955_s2 }
  0x49   :  { %p681_p6 = pnand %p679_p5, %p676_p4 }
  0x4b   :  { %684 = shalt.err (!%p681_p6)
}
  0x4c   :  { %s685_s10 = scalar_lea.vmem %s46_s20, 16  ;;  %s689_s13 = scalar_lea.vmem %s46_s20, 32 }
  0x4d   :  { %p686_p7 = scmp.ne.s32.totalorder %s46_s20, %s685_s10  ;;  %p690_p8 = scmp.lt.s32.totalorder %s46_s20, %s46_s20 }
  0x4e   :  { %p691_p9 = scmp.lt.s32.totalorder %s689_s13, %s685_s10 }
  0x50   :  { %p692_p10 = por %p691_p9, %p690_p8 }
  0x52   :  { %p693_p11 = pnand %p692_p10, %p686_p7 }
  0x54   :  { %696 = shalt.err (!%p693_p11)
}
  0x55   :  { %48 = dma.hbm_to_vmem [thread:$0]  %s955_s2, 16, %s46_s20, [#allocation6]  }
  0x56   :  { %s780_s3 = smov [#allocation10]   ;;  %s781_s16 = smov [#allocation13]  }
  0x57   :  { %s67_s15 = sshll.u32 %s780_s3, 4  ;;  %s89_s17 = sshll.u32 %s781_s16, 4  ;;  %s68_s15 = int_to_ptr.vmem [resolvable:$true] %s67_s15  ;;  %s90_s17 = int_to_ptr.vmem [resolvable:$true] %s89_s17 }
  0x58   :  { %s697_s22 = scalar_lea.hbm %s957_s4, 16 }
  0x59   :  { %p698_p12 = scmp.ne.s32.totalorder %s957_s4, %s697_s22  ;;  %p701_p13 = scmp.lt.u32.totalorder %s697_s22, %s957_s4 }
  0x5b   :  { %p703_p0 = pnand %p701_p13, %p698_p12 }
  0x5d   :  { %706 = shalt.err (!%p703_p0)
}
  0x5e   :  { %s707_s2 = scalar_lea.vmem %s68_s15, 16  ;;  %s711_s20 = scalar_lea.vmem %s68_s15, 32 }
  0x5f   :  { %p708_p1 = scmp.ne.s32.totalorder %s68_s15, %s707_s2  ;;  %p712_p2 = scmp.lt.s32.totalorder %s68_s15, %s68_s15 }
  0x60   :  { %p713_p3 = scmp.lt.s32.totalorder %s711_s20, %s707_s2 }
  0x62   :  { %p714_p4 = por %p713_p3, %p712_p2 }
  0x64   :  { %p715_p5 = pnand %p714_p4, %p708_p1 }
  0x66   :  { %718 = shalt.err (!%p715_p5)
}
  0x67   :  { %70 = dma.hbm_to_vmem [thread:$0]  %s957_s4, 16, %s68_s15, [#allocation9]  }
  0x68   :  { %s719_s18 = scalar_lea.hbm %s959_s6, 16 }
  0x69   :  { %p720_p6 = scmp.ne.s32.totalorder %s959_s6, %s719_s18  ;;  %p723_p7 = scmp.lt.u32.totalorder %s719_s18, %s959_s6 }
  0x6b   :  { %p725_p8 = pnand %p723_p7, %p720_p6 }
  0x6d   :  { %728 = shalt.err (!%p725_p8)
}
  0x6e   :  { %s729_s8 = scalar_lea.vmem %s90_s17, 16  ;;  %s733_s9 = scalar_lea.vmem %s90_s17, 32 }
  0x6f   :  { %p730_p9 = scmp.ne.s32.totalorder %s90_s17, %s729_s8  ;;  %p734_p10 = scmp.lt.s32.totalorder %s90_s17, %s90_s17 }
  0x70   :  { %p735_p11 = scmp.lt.s32.totalorder %s733_s9, %s729_s8 }
  0x72   :  { %p736_p12 = por %p735_p11, %p734_p10 }
  0x74   :  { %p737_p13 = pnand %p736_p12, %p730_p9 }
  0x76   :  { %740 = shalt.err (!%p737_p13)
}
  0x77   :  { %92 = dma.hbm_to_vmem [thread:$0]  %s959_s6, 16, %s90_s17, [#allocation12]  }
  0x78   :  { %763 = dma.done.wait [#allocation3], 128  }
  0x79   :  { %764 = vsyncadd [#allocation3], 4294967168 }
  0x7a   :  { %765 = dma.done.wait [#allocation6], 272  }
  0x7b   :  { %766 = vsyncadd [#allocation6], 4294967024 }
  0x7c   :  { %767 = dma.done.wait [#allocation9], 2064  }
  0x7d   :  { %768 = vsyncadd [#allocation9], 4294965232 }
  0x7e   :  { %769 = dma.done.wait [#allocation12], 2064  }
  0x7f   :  { %770 = vsyncadd [#allocation12], 4294965232  ;;  %v782_v0 = vmov 0.0|0.0   ;;  %vm783_vm0 = vmmov 0   ;;  %v784_v1 = vmov 0.0   ;;  %v115_v2 = vld [vmem:[#allocation5] sm:$0xff] }
  0x80   :  { %523 = vmatprep.subr.bf16.mxu0 %v782_v0  ;;  %450 = vmatprep.mubr.msk.f32.mxu0 %vm783_vm0, %v784_v1  ;;  %v116_v3 = vld [vmem:[#allocation5 + $0x8] sm:$0xff]  ;;  %v199_v5 = vld [vmem:[#allocation8] sm:$0xff]  ;;  %v200_v6 = vld [vmem:[#allocation8 + $0x8] sm:$0xff]  ;;  %vm124_vm1 = vcmask 130048   ;;  %s785_s6 = smov [#allocation14]  }
  0x81   :  { %526 = vmatprep.subr.bf16.mxu1 %v782_v0  ;;  %485 = vmatprep.mubr.msk.f32.mxu1 %vm783_vm0, %v784_v1  ;;  %v524_v4 = vpack.c.bf16 %v116_v3, %v115_v2  ;;  %v201_v7 = vld [vmem:[#allocation8 + $0x10] sm:$0xff]  ;;  %v527_v8 = vpack.c.bf16 %v200_v6, %v199_v5  ;;  %v202_v9 = vld [vmem:[#allocation8 + $0x18] sm:$0xff]  ;;  %v114_v10 = vld [vmem:[#allocation2] sm:$0xff]  ;;  %s393_s13 = sshll.u32 %s785_s6, 4  ;;  %s394_s13 = int_to_ptr.vmem [resolvable:$true] %s393_s13 }
  0x82   :  { %v530_v11 = vpack.c.bf16 %v202_v9, %v201_v7  ;;  %v203_v12 = vld [vmem:[#allocation8 + $0x20] sm:$0xff]  ;;  %v204_v13 = vld [vmem:[#allocation8 + $0x28] sm:$0xff]  ;;  %v205_v15 = vld [vmem:[#allocation8 + $0x30] sm:$0xff]  ;;  %s741_s0 = scalar_lea.vmem %s394_s13, 128  ;;  %p746_p1 = scmp.lt.s32.totalorder %s394_s13, %s394_s13 }
  0x83   :  { %525 = vmatpush3.bf16.msra.mxu0 %v524_v4  ;;  %528 = vmatpush3.bf16.msra.mxu1 %v527_v8  ;;  %v533_v14 = vpack.c.bf16 %v204_v13, %v203_v12  ;;  %v206_v16 = vld [vmem:[#allocation8 + $0x38] sm:$0xff]  ;;  %v207_v18 = vld [vmem:[#allocation8 + $0x40] sm:$0xff]  ;;  %v208_v19 = vld [vmem:[#allocation8 + $0x48] sm:$0xff]  ;;  %p742_p0 = scmp.ne.s32.totalorder %s394_s13, %s741_s0  ;;  %p747_p2 = scmp.lt.s32.totalorder %s741_s0, %s741_s0 }
  0x84   :  { %550 = vmatprep.subr.bf16.mxu0 %v782_v0  ;;  %529 = vmatprep.subr.bf16.mxu1 %v782_v0  ;;  %v536_v17 = vpack.c.bf16 %v206_v16, %v205_v15  ;;  %v539_v20 = vpack.c.bf16 %v208_v19, %v207_v18  ;;  %v209_v21 = vld [vmem:[#allocation8 + $0x50] sm:$0xff]  ;;  %v210_v22 = vld [vmem:[#allocation8 + $0x58] sm:$0xff]  ;;  %v211_v24 = vld [vmem:[#allocation8 + $0x60] sm:$0xff] }
  0x85   :  { %v542_v23 = vpack.c.bf16 %v210_v22, %v209_v21  ;;  %v212_v25 = vld [vmem:[#allocation8 + $0x68] sm:$0xff]  ;;  %v213_v27 = vld [vmem:[#allocation8 + $0x70] sm:$0xff]  ;;  %v214_v28 = vld [vmem:[#allocation8 + $0x78] sm:$0xff]  ;;  %p748_p3 = por %p747_p2, %p746_p1 }
  0x86   :  { %451 = vmatmul.mubr.msk.f32.vlgmr.msra.gmra.mrb[0].mxu0 %vm124_vm1, %v114_v10  ;;  %v545_v26 = vpack.c.bf16 %v212_v25, %v211_v24  ;;  %v548_v29 = vpack.c.bf16 %v214_v28, %v213_v27  ;;  %v293_v30 = vld [vmem:[#allocation11] sm:$0xff]  ;;  %v294_v31 = vld [vmem:[#allocation11 + $0x8] sm:$0xff]  ;;  %v295_v32 = vld [vmem:[#allocation11 + $0x10] sm:$0xff] }
  0x87   :  { %520 = vmatprep.mubr.msk.f32.mxu0 %vm783_vm0, %v784_v1  ;;  %531 = vmatpush3.bf16.msra.mxu1 %v530_v11  ;;  %v551_v33 = vpack.c.bf16 %v294_v31, %v293_v30  ;;  %v296_v34 = vld [vmem:[#allocation11 + $0x18] sm:$0xff]  ;;  %v297_v36 = vld [vmem:[#allocation11 + $0x20] sm:$0xff]  ;;  %v298_v37 = vld [vmem:[#allocation11 + $0x28] sm:$0xff]  ;;  %p749_p4 = pnand %p748_p3, %p742_p0 }
  0x88   :  { %532 = vmatprep.subr.bf16.mxu1 %v782_v0  ;;  %v554_v35 = vpack.c.bf16 %v296_v34, %v295_v32  ;;  %v557_v38 = vpack.c.bf16 %v298_v37, %v297_v36  ;;  %v299_v39 = vld [vmem:[#allocation11 + $0x30] sm:$0xff]  ;;  %v300_v40 = vld [vmem:[#allocation11 + $0x38] sm:$0xff]  ;;  %v301_v42 = vld [vmem:[#allocation11 + $0x40] sm:$0xff] }
  0x89   :  { %552 = vmatpush3.bf16.msra.mxu0 %v551_v33  ;;  %v560_v41 = vpack.c.bf16 %v300_v40, %v299_v39  ;;  %v302_v43 = vld [vmem:[#allocation11 + $0x48] sm:$0xff]  ;;  %v303_v45 = vld [vmem:[#allocation11 + $0x50] sm:$0xff]  ;;  %v304_v46 = vld [vmem:[#allocation11 + $0x58] sm:$0xff] }
  0x8a   :  { %553 = vmatprep.subr.bf16.mxu0 %v782_v0  ;;  %v563_v44 = vpack.c.bf16 %v302_v43, %v301_v42  ;;  %v566_v47 = vpack.c.bf16 %v304_v46, %v303_v45  ;;  %v305_v48 = vld [vmem:[#allocation11 + $0x60] sm:$0xff]  ;;  %v306_v49 = vld [vmem:[#allocation11 + $0x68] sm:$0xff]  ;;  %v405_v51 = vld [vmem:[#allocation7] ss:$0 sm:$0xff] }
  0x8b   :  { %534 = vmatpush3.bf16.msra.mxu1 %v533_v14  ;;  %v569_v50 = vpack.c.bf16 %v306_v49, %v305_v48  ;;  %v307_v56 = vld [vmem:[#allocation11 + $0x70] sm:$0xff]  ;;  %v308_v57 = vld [vmem:[#allocation11 + $0x78] sm:$0xff]  ;;  %v408_v1 = vld [vmem:[#allocation13] ss:$0 sm:$0xff] }
  0x8c   :  { %535 = vmatprep.subr.bf16.mxu1 %v782_v0  ;;  %v572_v58 = vpack.c.bf16 %v308_v57, %v307_v56  ;;  %v407_v59 = vld [vmem:[#allocation10] ss:$0 sm:$0xff] }
  0x8d   :  { %555 = vmatpush3.bf16.msra.mxu0 %v554_v35 }
  0x8e   :  { %556 = vmatprep.subr.bf16.mxu0 %v782_v0 }
  0x8f   :  { %537 = vmatpush3.bf16.msra.mxu1 %v536_v17 }
  0x90   :  { %538 = vmatprep.subr.bf16.mxu1 %v782_v0 }
  0x91   :  { %558 = vmatpush3.bf16.msra.mxu0 %v557_v38 }
  0x92   :  { %559 = vmatprep.subr.bf16.mxu0 %v782_v0 }
  0x93   :  { %540 = vmatpush3.bf16.msra.mxu1 %v539_v20 }
  0x94   :  { %541 = vmatprep.subr.bf16.mxu1 %v782_v0 }
  0x95   :  { %561 = vmatpush3.bf16.msra.mxu0 %v560_v41 }
  0x96   :  { %562 = vmatprep.subr.bf16.mxu0 %v782_v0 }
  0x97   :  { %543 = vmatpush3.bf16.msra.mxu1 %v542_v23 }
  0x98   :  { %544 = vmatprep.subr.bf16.mxu1 %v782_v0 }
  0x99   :  { %564 = vmatpush3.bf16.msra.mxu0 %v563_v44 }
  0x9a   :  { %565 = vmatprep.subr.bf16.mxu0 %v782_v0 }
  0x9b   :  { %546 = vmatpush3.bf16.msra.mxu1 %v545_v26 }
  0x9c   :  { %547 = vmatprep.subr.bf16.mxu1 %v782_v0 }
  0x9d   :  { %567 = vmatpush3.bf16.msra.mxu0 %v566_v47 }
  0x9e   :  { %568 = vmatprep.subr.bf16.mxu0 %v782_v0 }
  0x9f   :  { %549 = vmatpush3.bf16.msra.mxu1 %v548_v29 }
  0xa1   :  { %570 = vmatpush3.bf16.msra.mxu0 %v569_v50 }
  0xa2   :  { %571 = vmatprep.subr.bf16.mxu0 %v782_v0 }
  0xa5   :  { %573 = vmatpush3.bf16.msra.mxu0 %v572_v58 }
 0x159   :  { %v194_v52 = vpop.f32.mrb[0].mxu0 }
 0x15a   :  { %v195_v53 = vadd.f32 %v405_v51, %v194_v52  ;;  %v452_v54 = vpop.f32.mrb[1].mxu0 }
 0x15c   :  { %v198_v55 = vmax.f32 %v195_v53, 0.0 }
 0x15e   :  { %486 = vmatmul.mubr.f32.vlgmr.msra.gmra.mrb[0].mxu1 %v198_v55 }
 0x231   :  { %v288_v60 = vpop.f32.mrb[0].mxu1 }
 0x232   :  { %v289_v61 = vadd.f32 %v407_v59, %v288_v60  ;;  %v487_v62 = vpop.f32.mrb[1].mxu1 }
 0x234   :  { %v292_v63 = vmax.f32 %v289_v61, 0.0 }
 0x236   :  { %521 = vmatmul.mubr.f32.vlgmr.msra.gmra.mrb[2].mxu0 %v292_v63 }
 0x309   :  { %v382_v0 = vpop.f32.mrb[2].mxu0 }
 0x30a   :  { %v383_v2 = vadd.f32 %v408_v1, %v382_v0  ;;  %v522_v3 = vpop.f32.mrb[3].mxu0 }
 0x30c   :  { %386 = vst.msk [vmem:[#allocation14] sm:$0xff] %vm124_vm1, %v383_v2 }
 0x30d   :  { %752 = shalt.err (!%p749_p4)
}
 0x30e   :  { %s753_s15 = scalar_lea.hbm %s960_s7, 128 }
 0x30f   :  { %p754_p5 = scmp.ne.s32.totalorder %s960_s7, %s753_s15  ;;  %p757_p6 = scmp.lt.u32.totalorder %s753_s15, %s960_s7 }
 0x311   :  { %p759_p7 = pnand %p757_p6, %p754_p5 }
 0x313   :  { %762 = shalt.err (!%p759_p7)
}
 0x314   :  { %396 = dma.vmem_to_hbm [thread:$0]  %s394_s13, 128, %s960_s7, [#allocation4]  }
 0x315   :  { %771 = dma.done.wait [#allocation4], 128  }
 0x316   :  { %772 = vsyncadd [#allocation4], 4294967168 }
 0x317   :  { %400 = vsyncpa [#allocation3], 1 }
 0x318   :  { %401 = vsyncpa [#allocation6], 1 }
 0x319   :  { %402 = vsyncpa [#allocation9], 1 }
 0x31a   :  { %403 = vsyncpa [#allocation12], 1 }
 0x31b   :  { %404 = vsyncpa [#allocation4], 1 }

</bundles_post_ra>
